<compile_context>
chip_gen: v7x
topology: tpu7x:2x2x1
jax: 0.10.0
libtpu: 0.0.40
codegen_flags: <defaults>
</compile_context>

<pallas_src>
import functools

import jax
import jax.numpy as jnp
from jax.experimental import pallas as pl
from jax.experimental.pallas import tpu as pltpu

_SUBLANE = 8


def _round_up(x, m):
    return (x + m - 1) // m * m


def _fused_mlp_kernel(*refs, n_layers, sigmoid, compute_dtype):
    """refs = (x_ref, w0, b0, w1, b1, ..., o_ref). Whole fused MLP per batch tile."""
    x_ref, o_ref = refs[0], refs[-1]
    wb = refs[1:-1]
    h = x_ref[...].astype(compute_dtype)
    for i in range(n_layers):
        w = wb[2 * i][...]          # [in, out], stored in compute_dtype
        b = wb[2 * i + 1][...]      # [1, out], f32, broadcasts over rows
        # MXU matmul with f32 accumulation; bias/activation on VPU/EUP in f32.
        h = jnp.dot(h, w, preferred_element_type=jnp.float32) + b
        if i < n_layers - 1:
            h = jnp.maximum(h, 0.0).astype(compute_dtype)
        elif sigmoid:
            h = jax.nn.sigmoid(h)
    o_ref[...] = h.astype(o_ref.dtype)   # narrow (tile_b, Dout) store


def init_fc_params(key, input_size, hidden_unit, bias_flags):
    """Xavier-normal weights (gain=1.0), zero biases — matches the module init.

    Weights are stored as [in_features, out_features] so y = x @ W + b, which
    matches torch's x @ W_t.T + b with W = W_t.T.
    NOTE: bias_flags is honoured only as "zero bias always added" — numerically
    identical for this init; real checkpoints with bias=False would need care.
    """
    params = []
    dims = [input_size] + list(hidden_unit)
    for i in range(len(hidden_unit)):
        fan_in, fan_out = dims[i], dims[i + 1]
        key, sub = jax.random.split(key)
        std = (2.0 / (fan_in + fan_out)) ** 0.5
        w = std * jax.random.normal(sub, (fan_in, fan_out), dtype=jnp.float32)
        b = jnp.zeros((fan_out,), dtype=jnp.float32)
        params.append((w, b))
    return params


def prepare_params(params, compute_dtype=jnp.float32):
    """Cast weights to the streaming/compute dtype; biases stay f32 (row vecs).

    compute_dtype=jnp.bfloat16 halves the dominant x/weight HBM traffic on
    v6e/v7x (and is valid on v5e's MXU); f32 accumulation inside the kernel
    preserves matmul precision.
    """
    prepped = []
    for w, b in params:
        prepped.append((w.astype(compute_dtype),
                        b.reshape(1, -1).astype(jnp.float32)))
    return prepped


def fully_connected_layer(x, params, *, sigmoid=True, tile_b=2048):
    """Forward: Linear0 -> ReLU -> Linear1 -> ReLU -> Linear2 [-> Sigmoid].

    One fused pallas_call; grid only over batch tiles. Weights/biases are
    VMEM-resident (constant block index) across all grid steps.
    """
    B, Din = x.shape
    n_layers = len(params)
    compute_dtype = params[0][0].dtype
    dout = params[-1][0].shape[1]
    assert params[0][0].shape[0] == Din

    # Stream x in the compute dtype (bf16 option halves input HBM traffic).
    if x.dtype != compute_dtype:
        x = x.astype(compute_dtype)

    # Tile sizing: big tiles amortize the ~0.35us per-step overhead, but keep
    # >= 2 grid steps when the batch allows it so v7x's 2 TCs both get work.
    tile_b = min(tile_b, _round_up(B, _SUBLANE))
    if pl.cdiv(B, tile_b) < 2 and B > 2 * _SUBLANE:
        tile_b = _round_up(pl.cdiv(B, 2), _SUBLANE)
    num_tiles = pl.cdiv(B, tile_b)

    in_specs = [pl.BlockSpec((tile_b, Din), lambda i: (i, 0))]
    flat_args = [x]
    for w, b in params:
        in_specs.append(pl.BlockSpec(w.shape, lambda i: (0, 0)))  # resident weight
        in_specs.append(pl.BlockSpec(b.shape, lambda i: (0, 0)))  # resident bias
        flat_args.extend([w, b])

    # Advisory cost so XLA schedules neighbours around this mostly-DMA call.
    dims = [Din] + [w.shape[1] for w, _ in params]
    flops = 2 * B * sum(dims[i] * dims[i + 1] for i in range(n_layers))
    transcendentals = B * dout if sigmoid else 0
    bytes_accessed = (
        B * Din * x.dtype.itemsize
        + sum(w.size * w.dtype.itemsize + b.size * b.dtype.itemsize
              for w, b in params)
        + B * dout * 4
    )
    cost = pl.CostEstimate(flops=flops, transcendentals=transcendentals,
                           bytes_accessed=bytes_accessed)

    kernel = functools.partial(
        _fused_mlp_kernel,
        n_layers=n_layers,
        sigmoid=sigmoid,
        compute_dtype=compute_dtype,
    )

    out = pl.pallas_call(
        kernel,
        out_shape=jax.ShapeDtypeStruct((B, dout), jnp.float32),
        grid=(num_tiles,),
        in_specs=in_specs,
        out_specs=pl.BlockSpec((tile_b, dout), lambda i: (i, 0)),
        compiler_params=pltpu.CompilerParams(
            # Batch tiles are independent -> shard across v7x's 2 TensorCores.
            dimension_semantics=("parallel",),
        ),
        cost_estimate=cost,
    )(*flat_args)

    return out  # already (B, dout); no wrapper-side slicing pass


def _reference(x, params, *, sigmoid=True):
    # Pure-JAX reference for correctness checking (uses the unpacked params).
    n = len(params)
    h = x
    for i, (w, b) in enumerate(params):
        h = h @ w + b
        if i < n - 1:
            h = jnp.maximum(h, 0.0)
        elif sigmoid:
            h = jax.nn.sigmoid(h)
    return h


if __name__ == "__main__":
    key = jax.random.PRNGKey(0)

    # Module config
    input_size = 32
    hidden_unit = [64, 32, 8]
    bias_flags = [True, True, True]
    use_sigmoid = True
    batch = 8

    key, xkey = jax.random.split(key)
    x = jax.random.normal(xkey, (batch, input_size), dtype=jnp.float32)

    raw_params = init_fc_params(key, input_size, hidden_unit, bias_flags)
    # compute_dtype=jnp.bfloat16 is the v6e/v7x large-batch serving option;
    # f32 here so the tight reference tolerance holds.
    params = prepare_params(raw_params, compute_dtype=jnp.float32)

    out = fully_connected_layer(x, params, sigmoid=use_sigmoid)
    out = jax.block_until_ready(out)

    ref = _reference(x, raw_params, sigmoid=use_sigmoid)
    assert out.shape == (batch, hidden_unit[-1])
    assert jnp.allclose(out, ref, atol=1e-5, rtol=1e-5)

    # TODO(synk): batch_norm / Dice / PReLU branches of the module are not
    # exercised in the default config and are not implemented here.

    print("KERNEL_OK")
</pallas_src>

<mosaic_0001>
module attributes {stable_mosaic.version = 11 : i64} {
  func.func @_fused_mlp_kernel(%arg0: i32, %arg1: memref<8x32xf32, #tpu.memory_space<vmem>>, %arg2: memref<32x64xf32, #tpu.memory_space<vmem>>, %arg3: memref<1x64xf32, #tpu.memory_space<vmem>>, %arg4: memref<64x32xf32, #tpu.memory_space<vmem>>, %arg5: memref<1x32xf32, #tpu.memory_space<vmem>>, %arg6: memref<32x8xf32, #tpu.memory_space<vmem>>, %arg7: memref<1x8xf32, #tpu.memory_space<vmem>>, %arg8: memref<8x8xf32, #tpu.memory_space<vmem>>) attributes {dimension_semantics = [#tpu.dimension_semantics<parallel>], iteration_bounds = array<i64: 1>, scalar_prefetch = 0 : i64, scratch_operands = 0 : i64, tpu.core_type = #tpu.core_type<tc>, window_params = [{transform_indices = @transform_0, window_bounds = array<i64: 8, 32>}, {pipeline_mode = #tpu.pipeline_mode<synchronous>, transform_indices = @transform_1, window_bounds = array<i64: 32, 64>}, {pipeline_mode = #tpu.pipeline_mode<synchronous>, transform_indices = @transform_2, window_bounds = array<i64: 1, 64>}, {pipeline_mode = #tpu.pipeline_mode<synchronous>, transform_indices = @transform_3, window_bounds = array<i64: 64, 32>}, {pipeline_mode = #tpu.pipeline_mode<synchronous>, transform_indices = @transform_4, window_bounds = array<i64: 1, 32>}, {pipeline_mode = #tpu.pipeline_mode<synchronous>, transform_indices = @transform_5, window_bounds = array<i64: 32, 8>}, {pipeline_mode = #tpu.pipeline_mode<synchronous>, transform_indices = @transform_6, window_bounds = array<i64: 1, 8>}, {transform_indices = @transform_7, window_bounds = array<i64: 8, 8>}]} {
    %c0 = arith.constant 0 : index
    %c0_0 = arith.constant 0 : index
    %0 = vector.load %arg1[%c0, %c0_0] : memref<8x32xf32, #tpu.memory_space<vmem>>, vector<8x32xf32>
    %c0_1 = arith.constant 0 : index
    %c0_2 = arith.constant 0 : index
    %1 = vector.load %arg2[%c0_1, %c0_2] : memref<32x64xf32, #tpu.memory_space<vmem>>, vector<32x64xf32>
    %c0_3 = arith.constant 0 : index
    %c0_4 = arith.constant 0 : index
    %2 = vector.load %arg3[%c0_3, %c0_4] : memref<1x64xf32, #tpu.memory_space<vmem>>, vector<1x64xf32>
    %cst = arith.constant dense<0.000000e+00> : vector<8x64xf32>
    %3 = tpu.matmul %0, %1, %cst {dimension_numbers = #tpu.dot_dimension_numbers<[1], [0], [0], [1], [0, 0, 1, 1], [], []>} : vector<8x32xf32>, vector<32x64xf32>, vector<8x64xf32> -> vector<8x64xf32>
    %4 = vector.broadcast %2 : vector<1x64xf32> to vector<8x64xf32>
    %5 = arith.addf %3, %4 : vector<8x64xf32>
    %cst_5 = arith.constant 0.000000e+00 : f32
    %6 = vector.broadcast %cst_5 : f32 to vector<8x64xf32>
    %7 = arith.maximumf %5, %6 : vector<8x64xf32>
    %c0_6 = arith.constant 0 : index
    %c0_7 = arith.constant 0 : index
    %8 = vector.load %arg4[%c0_6, %c0_7] : memref<64x32xf32, #tpu.memory_space<vmem>>, vector<64x32xf32>
    %c0_8 = arith.constant 0 : index
    %c0_9 = arith.constant 0 : index
    %9 = vector.load %arg5[%c0_8, %c0_9] : memref<1x32xf32, #tpu.memory_space<vmem>>, vector<1x32xf32>
    %cst_10 = arith.constant dense<0.000000e+00> : vector<8x32xf32>
    %10 = tpu.matmul %7, %8, %cst_10 {dimension_numbers = #tpu.dot_dimension_numbers<[1], [0], [0], [1], [0, 0, 1, 1], [], []>} : vector<8x64xf32>, vector<64x32xf32>, vector<8x32xf32> -> vector<8x32xf32>
    %11 = vector.broadcast %9 : vector<1x32xf32> to vector<8x32xf32>
    %12 = arith.addf %10, %11 : vector<8x32xf32>
    %cst_11 = arith.constant 0.000000e+00 : f32
    %13 = vector.broadcast %cst_11 : f32 to vector<8x32xf32>
    %14 = arith.maximumf %12, %13 : vector<8x32xf32>
    %c0_12 = arith.constant 0 : index
    %c0_13 = arith.constant 0 : index
    %15 = vector.load %arg6[%c0_12, %c0_13] : memref<32x8xf32, #tpu.memory_space<vmem>>, vector<32x8xf32>
    %c0_14 = arith.constant 0 : index
    %c0_15 = arith.constant 0 : index
    %16 = vector.load %arg7[%c0_14, %c0_15] : memref<1x8xf32, #tpu.memory_space<vmem>>, vector<1x8xf32>
    %cst_16 = arith.constant dense<0.000000e+00> : vector<8x8xf32>
    %17 = tpu.matmul %14, %15, %cst_16 {dimension_numbers = #tpu.dot_dimension_numbers<[1], [0], [0], [1], [0, 0, 1, 1], [], []>} : vector<8x32xf32>, vector<32x8xf32>, vector<8x8xf32> -> vector<8x8xf32>
    %18 = vector.broadcast %16 : vector<1x8xf32> to vector<8x8xf32>
    %19 = arith.addf %17, %18 : vector<8x8xf32>
    %20 = arith.negf %19 : vector<8x8xf32>
    %21 = math.exp %20 : vector<8x8xf32>
    %cst_17 = arith.constant 1.000000e+00 : f32
    %22 = vector.broadcast %cst_17 : f32 to vector<8x8xf32>
    %23 = arith.addf %22, %21 : vector<8x8xf32>
    %24 = arith.divf %22, %23 : vector<8x8xf32>
    %c0_18 = arith.constant 0 : index
    %c0_19 = arith.constant 0 : index
    %25 = vector.load %arg8[%c0_18, %c0_19] : memref<8x8xf32, #tpu.memory_space<vmem>>, vector<8x8xf32>
    tpu.vector_store %arg8[%c0_18, %c0_19], %24 {strides = array<i32>} : memref<8x8xf32, #tpu.memory_space<vmem>>, vector<8x8xf32>,
    return
  }
  func.func @transform_0(%arg0: i32) -> (i32, i32) {
    %c0_i32 = arith.constant 0 : i32
    %c0_i32_0 = arith.constant 0 : i32
    return %arg0, %c0_i32 : i32, i32
  }
  func.func @transform_1(%arg0: i32) -> (i32, i32) {
    %c0_i32 = arith.constant 0 : i32
    %c0_i32_0 = arith.constant 0 : i32
    %c0_i32_1 = arith.constant 0 : i32
    return %c0_i32, %c0_i32_0 : i32, i32
  }
  func.func @transform_2(%arg0: i32) -> (i32, i32) {
    %c0_i32 = arith.constant 0 : i32
    %c0_i32_0 = arith.constant 0 : i32
    %c0_i32_1 = arith.constant 0 : i32
    return %c0_i32, %c0_i32_0 : i32, i32
  }
  func.func @transform_3(%arg0: i32) -> (i32, i32) {
    %c0_i32 = arith.constant 0 : i32
    %c0_i32_0 = arith.constant 0 : i32
    %c0_i32_1 = arith.constant 0 : i32
    return %c0_i32, %c0_i32_0 : i32, i32
  }
  func.func @transform_4(%arg0: i32) -> (i32, i32) {
    %c0_i32 = arith.constant 0 : i32
    %c0_i32_0 = arith.constant 0 : i32
    %c0_i32_1 = arith.constant 0 : i32
    return %c0_i32, %c0_i32_0 : i32, i32
  }
  func.func @transform_5(%arg0: i32) -> (i32, i32) {
    %c0_i32 = arith.constant 0 : i32
    %c0_i32_0 = arith.constant 0 : i32
    %c0_i32_1 = arith.constant 0 : i32
    return %c0_i32, %c0_i32_0 : i32, i32
  }
  func.func @transform_6(%arg0: i32) -> (i32, i32) {
    %c0_i32 = arith.constant 0 : i32
    %c0_i32_0 = arith.constant 0 : i32
    %c0_i32_1 = arith.constant 0 : i32
    return %c0_i32, %c0_i32_0 : i32, i32
  }
  func.func @transform_7(%arg0: i32) -> (i32, i32) {
    %c0_i32 = arith.constant 0 : i32
    %c0_i32_0 = arith.constant 0 : i32
    return %arg0, %c0_i32 : i32, i32
  }
}

</mosaic_0001>

<bundles_post_ra>
// kernel: tpu_custom_call.1
= control target key start
LH: loop header
LB: loop body
LE: loop exit
PB: predicated region body
PF: predicated region fallthrough
CT: control target
= control target key end

     0   :  { %v433_v3 = vmov 0.0|0.0   ;;  %vm434_vm0 = vmmov 0   ;;  %v435_v6 = vmov 0.0   ;;  %s554_s0 = inlined_call_operand.vmem [shape: f32[8,32], index: 0, kind: input, shape index: {}]   ;;  %s555_s1 = inlined_call_operand.vmem [shape: f32[32,64], index: 1, kind: input, shape index: {}]   ;;  %s556_s2 = inlined_call_operand.vmem [shape: f32[1,64], index: 2, kind: input, shape index: {}]   ;;  %s557_s3 = inlined_call_operand.vmem [shape: f32[64,32], index: 3, kind: input, shape index: {}]   ;;  %s558_s4 = inlined_call_operand.vmem [shape: f32[1,32], index: 4, kind: input, shape index: {}]   ;;  %s559_s5 = inlined_call_operand.vmem [shape: f32[32,8], index: 5, kind: input, shape index: {}]   ;;  %s560_s6 = inlined_call_operand.vmem [shape: f32[1,8], index: 6, kind: input, shape index: {}]   ;;  %s561_s7 = inlined_call_operand.hbm [shape: f32[8,8], index: 7, kind: output, shape index: {}]  }
   0x1   :  { %v28_v0 = vld [vmem:[%s555_s1] sm:$0xff]  ;;  %v29_v1 = vld [vmem:[%s555_s1 + $0x8] sm:$0xff]  ;;  %v30_v2 = vld [vmem:[%s555_s1 + $0x10] sm:$0xff]  ;;  %377 = vmatprep.subr.bf16.mxu0 %v433_v3  ;;  %344 = vmatprep.mubr.msk.f32.mxu0 %vm434_vm0, %v435_v6 }
   0x2   :  { %v378_v4 = vpack.c.bf16 %v29_v1, %v28_v0  ;;  %v31_v5 = vld [vmem:[%s555_s1 + $0x18] sm:$0xff]  ;;  %v114_v7 = vld [vmem:[%s557_s3] sm:$0xff]  ;;  %383 = vmatprep.subr.bf16.mxu1 %v433_v3  ;;  %v115_v8 = vld [vmem:[%s557_s3 + $0x8] sm:$0xff]  ;;  %363 = vmatprep.mubr.msk.f32.mxu1 %vm434_vm0, %v435_v6 }
   0x3   :  { %v116_v9 = vld [vmem:[%s557_s3 + $0x10] sm:$0xff]  ;;  %v117_v10 = vld [vmem:[%s557_s3 + $0x18] sm:$0xff]  ;;  %v381_v11 = vpack.c.bf16 %v31_v5, %v30_v2  ;;  %v384_v12 = vpack.c.bf16 %v115_v8, %v114_v7 }
   0x4   :  { %379 = vmatpush3.bf16.msra.mxu0 %v378_v4 }
   0x5   :  { %380 = vmatprep.subr.bf16.mxu0 %v433_v3 }
   0x6   :  { %12 = vsyncpa [#allocation3], 0  ;;  %385 = vmatpush3.bf16.msra.mxu1 %v384_v12  ;;  %v387_v13 = vpack.c.bf16 %v117_v10, %v116_v9  ;;  %v118_v14 = vld [vmem:[%s557_s3 + $0x20] sm:$0xff]  ;;  %v119_v15 = vld [vmem:[%s557_s3 + $0x28] sm:$0xff]  ;;  %vm39_vm1 = vcmask 261120   ;;  %vm129_vm2 = vcmask 523264  }
   0x7   :  { %386 = vmatprep.subr.bf16.mxu1 %v433_v3  ;;  %v27_v16 = vld [vmem:[%s554_s0] sm:$0xff]  ;;  %v390_v17 = vpack.c.bf16 %v119_v15, %v118_v14  ;;  %v120_v18 = vld [vmem:[%s557_s3 + $0x30] sm:$0xff]  ;;  %v121_v19 = vld [vmem:[%s557_s3 + $0x38] sm:$0xff]  ;;  %vm294_vm3 = vcmask 64512  }
   0x8   :  { %382 = vmatpush3.bf16.msra.mxu0 %v381_v11  ;;  %v393_v20 = vpack.c.bf16 %v121_v19, %v120_v18  ;;  %v204_v21 = vld [vmem:[%s559_s5] sm:$0xff]  ;;  %v205_v22 = vld [vmem:[%s559_s5 + $0x8] sm:$0xff]  ;;  %v206_v29 = vld [vmem:[%s559_s5 + $0x10] sm:$0xff] }
   0x9   :  { %395 = vmatprep.subr.bf16.mxu0 %v433_v3  ;;  %v396_v23 = vpack.c.bf16 %v205_v22, %v204_v21  ;;  %v310_v24 = vld [vmem:[%s556_s2] ss:$0 sm:$0xff]  ;;  %v207_v30 = vld [vmem:[%s559_s5 + $0x18] sm:$0xff]  ;;  %s436_s5 = smov [#allocation2]  }
   0xa   :  { %388 = vmatpush3.bf16.msra.mxu1 %v387_v13  ;;  %v399_v31 = vpack.c.bf16 %v207_v30, %v206_v29  ;;  %v312_v32 = vld [vmem:[%s558_s4] ss:$0 sm:$0xff]  ;;  %s302_s4 = sshll.u32 %s436_s5, 4  ;;  %s303_s4 = int_to_ptr.vmem [resolvable:$true] %s302_s4 }
   0xb   :  { %345 = vmatmul.mubr.msk.f32.vlgmr.msra.gmra.mrb[0].mxu0 %vm39_vm1, %v27_v16  ;;  %389 = vmatprep.subr.bf16.mxu1 %v433_v3  ;;  %v314_v37 = vld [vmem:[%s560_s6] ss:$0 sm:$0xff]  ;;  %s409_s14 = scalar_lea.vmem %s303_s4, 128  ;;  %p414_p1 = scmp.lt.s32.totalorder %s303_s4, %s303_s4 }
   0xc   :  { %374 = vmatprep.mubr.msk.f32.mxu0 %vm434_vm0, %v435_v6  ;;  %397 = vmatpush3.bf16.msra.mxu0 %v396_v23  ;;  %p410_p0 = scmp.ne.s32.totalorder %s303_s4, %s409_s14  ;;  %p415_p2 = scmp.lt.s32.totalorder %s409_s14, %s409_s14 }
   0xd   :  { %398 = vmatprep.subr.bf16.mxu0 %v433_v3 }
   0xe   :  { %391 = vmatpush3.bf16.msra.mxu1 %v390_v17  ;;  %p416_p3 = por %p415_p2, %p414_p1 }
   0xf   :  { %392 = vmatprep.subr.bf16.mxu1 %v433_v3 }
  0x10   :  { %400 = vmatpush3.bf16.msra.mxu0 %v399_v31  ;;  %p417_p4 = pnand %p416_p3, %p410_p0 }
  0x12   :  { %394 = vmatpush3.bf16.msra.mxu1 %v393_v20 }
  0xde   :  { %v109_v25 = vpop.f32.mrb[0].mxu0 }
  0xdf   :  { %v110_v26 = vadd.f32 %v310_v24, %v109_v25  ;;  %v346_v27 = vpop.f32.mrb[1].mxu0 }
  0xe1   :  { %v113_v28 = vmax.f32 %v110_v26, 0.0 }
  0xe3   :  { %364 = vmatmul.mubr.msk.f32.vlgmr.msra.gmra.mrb[0].mxu1 %vm129_vm2, %v113_v28 }
 0x1b6   :  { %v199_v33 = vpop.f32.mrb[0].mxu1 }
 0x1b7   :  { %v200_v34 = vadd.f32 %v312_v32, %v199_v33  ;;  %v365_v35 = vpop.f32.mrb[1].mxu1 }
 0x1b9   :  { %v203_v36 = vmax.f32 %v200_v34, 0.0 }
 0x1bb   :  { %375 = vmatmul.mubr.msk.f32.vlgmr.msra.gmra.mrb[2].mxu0 %vm39_vm1, %v203_v36 }
 0x28e   :  { %v284_v38 = vpop.f32.mrb[2].mxu0 }
 0x28f   :  { %v285_v39 = vadd.f32 %v314_v37, %v284_v38  ;;  %v376_v40 = vpop.f32.mrb[3].mxu0 }
 0x291   :  { %v316_v41 = vmul.f32 -1.442695, %v285_v39 }
 0x293   :  { %405 = vpow2.f32 %v316_v41 }
 0x29d   :  { %v406_v42 = vpop.eup %405 }
 0x29e   :  { %v291_v43 = vadd.f32 1.0, %v406_v42 }
 0x2a0   :  { %407 = vrcp.f32 %v291_v43 }
 0x2aa   :  { %v408_v44 = vpop.eup %407 }
 0x2ab   :  { %295 = vst.msk [vmem:[#allocation2] sm:$0xff] %vm294_vm3, %v408_v44 }
 0x2ac   :  { %420 = shalt.err (!%p417_p4)
}
 0x2ad   :  { %s421_s16 = scalar_lea.hbm %s561_s7, 128 }
 0x2ae   :  { %p422_p5 = scmp.ne.s32.totalorder %s561_s7, %s421_s16  ;;  %p425_p6 = scmp.lt.u32.totalorder %s421_s16, %s561_s7 }
 0x2b0   :  { %p427_p7 = pnand %p425_p6, %p422_p5 }
 0x2b2   :  { %430 = shalt.err (!%p427_p7)
}
 0x2b3   :  { %305 = dma.vmem_to_hbm [thread:$0]  %s303_s4, 128, %s561_s7, [#allocation3]  }
 0x2b4   :  { %431 = dma.done.wait [#allocation3], 128  }
 0x2b5   :  { %432 = vsyncadd [#allocation3], 4294967168 }
 0x2b6   :  { %309 = vsyncpa [#allocation3], 1 }

</bundles_post_ra>
